<compile_context>
chip_gen: v7x
topology: tpu7x:2x2x1
jax: 0.10.0
libtpu: 0.0.40
codegen_flags: <defaults>
</compile_context>

<pallas_src>
import numpy as np
import jax
import jax.numpy as jnp
from jax import lax
from jax.experimental import pallas as pl
from jax.experimental.pallas import tpu as pltpu


# ------------------------- Pallas kernel ------------------------------------


def lstm_kernel(x_ref, len_ref, wih_ref, whh_ref, c_out_ref):
    """Whole LSTM forward in one kernel invocation.

    x_ref    : (T*B, E)  f32   time-major flattened embeddings: row t*B + b
    len_ref  : (B, 1)    int32 sequence lengths
    wih_ref  : (E, 4H)   bf16  transposed weight_ih_l0
    whh_ref  : (H, 4H)   bf16  transposed weight_hh_l0
    c_out_ref: (B, H)    f32   final cell state
    """
    B, H = c_out_ref.shape
    T = x_ref.shape[0] // B
    H4 = 4 * H

    # ---- prologue (runs once) ----------------------------------------------
    wih = wih_ref[...]                                   # (E, 4H) bf16
    whh = whh_ref[...]                                   # (H, 4H) bf16
    lens = len_ref[...]                                  # (B, 1) int32

    # dropout(p=0) is identity; tanh nonlinearity in f32 (module ordering);
    # hoisted input projection as one bf16 MXU matmul with f32 accumulation.
    # At this size gin is only 8 f32 vregs -> keep it as a value (no VMEM scratch).
    xt = jnp.tanh(x_ref[...]).astype(jnp.bfloat16)       # (T*B, E)
    gin = jnp.dot(xt, wih, preferred_element_type=jnp.float32)   # (T*B, 4H) f32

    # Constant lane masks for the one-tanh gate activation (hoisted; built once):
    #   i/f/o lanes: sigmoid(x) = 0.5*tanh(0.5*x) + 0.5  -> mult=0.5, add=0.5
    #   g lanes    : tanh(x)                             -> mult=1.0, add=0.0
    lane = lax.broadcasted_iota(jnp.int32, (B, H4), 1)
    is_g = (lane >= 2 * H) & (lane < 3 * H)
    mult = jnp.where(is_g, 1.0, 0.5).astype(jnp.float32)
    add = jnp.where(is_g, 0.0, 0.5).astype(jnp.float32)

    # ---- serial recurrence (statically unrolled; T is small) ----------------
    h = jnp.zeros((B, H), jnp.float32)
    c = jnp.zeros((B, H), jnp.float32)

    for t in range(T):
        gates = gin[t * B:(t + 1) * B, :] + jnp.dot(
            h.astype(jnp.bfloat16), whh, preferred_element_type=jnp.float32)

        # Single full-width EUP pass over all 4H lanes, then static slicing.
        act = jnp.tanh(gates * mult) * mult + add        # (B, 4H)
        i_g = act[:, 0 * H:1 * H]
        f_g = act[:, 1 * H:2 * H]
        g_g = act[:, 2 * H:3 * H]
        o_g = act[:, 3 * H:4 * H]

        c_new = f_g * c + i_g * g_g
        h_new = o_g * jnp.tanh(c_new)

        # packed-sequence semantics: freeze rows whose length is exhausted.
        alive = t < lens                                 # (B, 1) broadcasts over H
        h = jnp.where(alive, h_new, h)
        c = jnp.where(alive, c_new, c)

    c_out_ref[...] = c.astype(c_out_ref.dtype)


def text_processor_forward(q, q_len, emb_weight, w_ih, w_hh):
    """q: (B, T) int32 token ids, q_len: (B,) int32. Returns final cell state (B, H)."""
    B, T = q.shape
    E = emb_weight.shape[1]
    H = w_hh.shape[1]

    # Embedding gather in plain JAX (tiny); flatten time-major so row t*B + b
    # holds token (b, t) -- lets the kernel hoist the input projection as one matmul.
    embedded = jnp.take(emb_weight, q, axis=0)                       # (B, T, E) f32
    x_flat = (jnp.transpose(embedded, (1, 0, 2))
              .reshape(T * B, E)
              .astype(jnp.float32))                                  # (T*B, E) f32

    wih_t = w_ih.T.astype(jnp.bfloat16)                              # (E, 4H)
    whh_t = w_hh.T.astype(jnp.bfloat16)                              # (H, 4H)
    len_2d = q_len.astype(jnp.int32).reshape(B, 1)                   # (B, 1)

    return pl.pallas_call(
        lstm_kernel,
        out_shape=jax.ShapeDtypeStruct((B, H), jnp.float32),
        in_specs=[
            pl.BlockSpec(memory_space=pltpu.MemorySpace.VMEM),       # x_flat
            pl.BlockSpec(memory_space=pltpu.MemorySpace.VMEM),       # q_len
            pl.BlockSpec(memory_space=pltpu.MemorySpace.VMEM),       # W_ih^T
            pl.BlockSpec(memory_space=pltpu.MemorySpace.VMEM),       # W_hh^T
        ],
        out_specs=pl.BlockSpec(memory_space=pltpu.MemorySpace.VMEM),
    )(x_flat, len_2d, wih_t, whh_t)


# ------------------------- deterministic parameter init ---------------------


def xavier_uniform(key, shape):
    fan_out, fan_in = shape
    bound = np.sqrt(6.0 / (fan_in + fan_out))
    return jax.random.uniform(key, shape, jnp.float32, -bound, bound)


def init_params(key, vocab, emb_features, lstm_features):
    k_emb, k_ih, k_hh = jax.random.split(key, 3)
    # Embedding: xavier_uniform over the whole table (matches module __init__).
    emb_weight = xavier_uniform(k_emb, (vocab, emb_features))

    # LSTM weights: xavier per gate chunk (chunk(4, 0)), gate order [i, f, g, o].
    H, E = lstm_features, emb_features
    ih_keys = jax.random.split(k_ih, 4)
    hh_keys = jax.random.split(k_hh, 4)
    w_ih = jnp.concatenate([xavier_uniform(k, (H, E)) for k in ih_keys], axis=0)  # (4H, E)
    w_hh = jnp.concatenate([xavier_uniform(k, (H, H)) for k in hh_keys], axis=0)  # (4H, H)
    # biases are zeroed in the module __init__ -> omitted.
    return emb_weight, w_ih, w_hh


# ------------------------- pure-JAX reference (for checking) ----------------


def reference_forward(q, q_len, emb_weight, w_ih, w_hh):
    B, T = q.shape
    H = w_hh.shape[1]
    x = jnp.tanh(jnp.take(emb_weight, q, axis=0))          # (B, T, E) f32

    def step(carry, t):
        h, c = carry
        gates = x[:, t, :] @ w_ih.T + h @ w_hh.T
        i = jax.nn.sigmoid(gates[:, 0 * H:1 * H])
        f = jax.nn.sigmoid(gates[:, 1 * H:2 * H])
        g = jnp.tanh(gates[:, 2 * H:3 * H])
        o = jax.nn.sigmoid(gates[:, 3 * H:4 * H])
        c_new = f * c + i * g
        h_new = o * jnp.tanh(c_new)
        alive = (t < q_len)[:, None]
        return (jnp.where(alive, h_new, h), jnp.where(alive, c_new, c)), None

    (h, c), _ = jax.lax.scan(step,
                             (jnp.zeros((B, H)), jnp.zeros((B, H))),
                             jnp.arange(T))
    return c


# ------------------------- main ---------------------------------------------

if __name__ == "__main__":
    VOCAB, E, H = 32, 32, 32   # embedding_tokens, embedding_features, lstm_features
    B, T = 8, 8                # batch, max sequence length

    key = jax.random.PRNGKey(0)
    k_params, k_q = jax.random.split(key)
    emb_weight, w_ih, w_hh = init_params(k_params, VOCAB, E, H)

    # token ids (nonzero for valid positions), sorted descending lengths like
    # pack_padded_sequence expects; positions past q_len[b] are padding (0).
    q_len = jnp.array([8, 7, 6, 5, 4, 3, 2, 1], dtype=jnp.int32)
    q_full = jax.random.randint(k_q, (B, T), 1, VOCAB, dtype=jnp.int32)
    pad_mask = jnp.arange(T)[None, :] < q_len[:, None]
    q = jnp.where(pad_mask, q_full, 0)

    out = text_processor_forward(q, q_len, emb_weight, w_ih, w_hh)
    out = jax.block_until_ready(out)

    ref = reference_forward(q, q_len, emb_weight, w_ih, w_hh)
    assert out.shape == (B, H)
    # bf16 MXU operands in the kernel (f32 accumulation) -> compare loosely vs f32 ref.
    assert np.allclose(np.asarray(out), np.asarray(ref), atol=1e-2, rtol=1e-2)

    print("KERNEL_OK")
</pallas_src>

<mosaic_0001>
module attributes {stable_mosaic.version = 11 : i64} {
  func.func @lstm_kernel(%arg0: memref<64x32xf32, #tpu.memory_space<vmem>>, %arg1: memref<8x1xi32, #tpu.memory_space<vmem>>, %arg2: memref<32x128xbf16, #tpu.memory_space<vmem>>, %arg3: memref<32x128xbf16, #tpu.memory_space<vmem>>, %arg4: memref<8x32xf32, #tpu.memory_space<vmem>>) attributes {dimension_semantics = [], scalar_prefetch = 0 : i64, scratch_operands = 0 : i64, tpu.core_type = #tpu.core_type<tc>} {
    %c0 = arith.constant 0 : index
    %c0_0 = arith.constant 0 : index
    %0 = vector.load %arg2[%c0, %c0_0] : memref<32x128xbf16, #tpu.memory_space<vmem>>, vector<32x128xbf16>
    %c0_1 = arith.constant 0 : index
    %c0_2 = arith.constant 0 : index
    %1 = vector.load %arg3[%c0_1, %c0_2] : memref<32x128xbf16, #tpu.memory_space<vmem>>, vector<32x128xbf16>
    %c0_3 = arith.constant 0 : index
    %c0_4 = arith.constant 0 : index
    %2 = vector.load %arg1[%c0_3, %c0_4] : memref<8x1xi32, #tpu.memory_space<vmem>>, vector<8x1xi32>
    %c0_5 = arith.constant 0 : index
    %c0_6 = arith.constant 0 : index
    %3 = vector.load %arg0[%c0_5, %c0_6] : memref<64x32xf32, #tpu.memory_space<vmem>>, vector<64x32xf32>
    %4 = math.tanh %3 : vector<64x32xf32>
    %5 = arith.truncf %4 : vector<64x32xf32> to vector<64x32xbf16>
    %cst = arith.constant dense<0.000000e+00> : vector<64x128xf32>
    %6 = tpu.matmul %5, %0, %cst {dimension_numbers = #tpu.dot_dimension_numbers<[1], [0], [0], [1], [0, 0, 1, 1], [], []>} : vector<64x32xbf16>, vector<32x128xbf16>, vector<64x128xf32> -> vector<64x128xf32>
    %7 = tpu.iota {dimensions = array<i32: 1>} : vector<8x128xi32>
    %c64_i32 = arith.constant 64 : i32
    %8 = vector.broadcast %c64_i32 : i32 to vector<8x128xi32>
    %9 = arith.cmpi sge, %7, %8 : vector<8x128xi32>
    %c96_i32 = arith.constant 96 : i32
    %10 = vector.broadcast %c96_i32 : i32 to vector<8x128xi32>
    %11 = arith.cmpi slt, %7, %10 : vector<8x128xi32>
    %12 = arith.andi %9, %11 : vector<8x128xi1>
    %cst_7 = arith.constant 1.000000e+00 : f32
    %cst_8 = arith.constant 5.000000e-01 : f32
    %13 = vector.broadcast %cst_7 : f32 to vector<8x128xf32>
    %14 = vector.broadcast %cst_8 : f32 to vector<8x128xf32>
    %15 = arith.select %12, %13, %14 : vector<8x128xi1>, vector<8x128xf32>
    %cst_9 = arith.constant 0.000000e+00 : f32
    %cst_10 = arith.constant 5.000000e-01 : f32
    %16 = vector.broadcast %cst_9 : f32 to vector<8x128xf32>
    %17 = vector.broadcast %cst_10 : f32 to vector<8x128xf32>
    %18 = arith.select %12, %16, %17 : vector<8x128xi1>, vector<8x128xf32>
    %cst_11 = arith.constant 0.000000e+00 : f32
    %19 = vector.broadcast %cst_11 : f32 to vector<8x32xf32>
    %cst_12 = arith.constant 0.000000e+00 : f32
    %20 = vector.broadcast %cst_12 : f32 to vector<8x32xf32>
    %21 = vector.extract_strided_slice %6 {offsets = [0, 0], sizes = [8, 128], strides = [1, 1]} : vector<64x128xf32> to vector<8x128xf32>
    %22 = arith.truncf %19 : vector<8x32xf32> to vector<8x32xbf16>
    %cst_13 = arith.constant dense<0.000000e+00> : vector<8x128xf32>
    %23 = tpu.matmul %22, %1, %cst_13 {dimension_numbers = #tpu.dot_dimension_numbers<[1], [0], [0], [1], [0, 0, 1, 1], [], []>} : vector<8x32xbf16>, vector<32x128xbf16>, vector<8x128xf32> -> vector<8x128xf32>
    %24 = arith.addf %21, %23 : vector<8x128xf32>
    %25 = arith.mulf %24, %15 : vector<8x128xf32>
    %26 = math.tanh %25 : vector<8x128xf32>
    %27 = arith.mulf %26, %15 : vector<8x128xf32>
    %28 = arith.addf %27, %18 : vector<8x128xf32>
    %29 = vector.extract_strided_slice %28 {offsets = [0, 0], sizes = [8, 32], strides = [1, 1]} : vector<8x128xf32> to vector<8x32xf32>
    %30 = vector.extract_strided_slice %28 {offsets = [0, 32], sizes = [8, 32], strides = [1, 1]} : vector<8x128xf32> to vector<8x32xf32>
    %31 = vector.extract_strided_slice %28 {offsets = [0, 64], sizes = [8, 32], strides = [1, 1]} : vector<8x128xf32> to vector<8x32xf32>
    %32 = vector.extract_strided_slice %28 {offsets = [0, 96], sizes = [8, 32], strides = [1, 1]} : vector<8x128xf32> to vector<8x32xf32>
    %33 = arith.mulf %30, %20 : vector<8x32xf32>
    %34 = arith.mulf %29, %31 : vector<8x32xf32>
    %35 = arith.addf %33, %34 : vector<8x32xf32>
    %36 = math.tanh %35 : vector<8x32xf32>
    %37 = arith.mulf %32, %36 : vector<8x32xf32>
    %c0_i32 = arith.constant 0 : i32
    %38 = vector.broadcast %c0_i32 : i32 to vector<8x1xi32>
    %39 = arith.cmpi sgt, %2, %38 : vector<8x1xi32>
    %40 = vector.shape_cast %39 : vector<8x1xi1> to vector<8x1xi1>
    %41 = vector.broadcast %40 : vector<8x1xi1> to vector<8x32xi1>
    %42 = arith.select %41, %37, %19 : vector<8x32xi1>, vector<8x32xf32>
    %43 = vector.shape_cast %39 : vector<8x1xi1> to vector<8x1xi1>
    %44 = vector.broadcast %43 : vector<8x1xi1> to vector<8x32xi1>
    %45 = arith.select %44, %35, %20 : vector<8x32xi1>, vector<8x32xf32>
    %46 = vector.extract_strided_slice %6 {offsets = [8, 0], sizes = [8, 128], strides = [1, 1]} : vector<64x128xf32> to vector<8x128xf32>
    %47 = arith.truncf %42 : vector<8x32xf32> to vector<8x32xbf16>
    %cst_14 = arith.constant dense<0.000000e+00> : vector<8x128xf32>
    %48 = tpu.matmul %47, %1, %cst_14 {dimension_numbers = #tpu.dot_dimension_numbers<[1], [0], [0], [1], [0, 0, 1, 1], [], []>} : vector<8x32xbf16>, vector<32x128xbf16>, vector<8x128xf32> -> vector<8x128xf32>
    %49 = arith.addf %46, %48 : vector<8x128xf32>
    %50 = arith.mulf %49, %15 : vector<8x128xf32>
    %51 = math.tanh %50 : vector<8x128xf32>
    %52 = arith.mulf %51, %15 : vector<8x128xf32>
    %53 = arith.addf %52, %18 : vector<8x128xf32>
    %54 = vector.extract_strided_slice %53 {offsets = [0, 0], sizes = [8, 32], strides = [1, 1]} : vector<8x128xf32> to vector<8x32xf32>
    %55 = vector.extract_strided_slice %53 {offsets = [0, 32], sizes = [8, 32], strides = [1, 1]} : vector<8x128xf32> to vector<8x32xf32>
    %56 = vector.extract_strided_slice %53 {offsets = [0, 64], sizes = [8, 32], strides = [1, 1]} : vector<8x128xf32> to vector<8x32xf32>
    %57 = vector.extract_strided_slice %53 {offsets = [0, 96], sizes = [8, 32], strides = [1, 1]} : vector<8x128xf32> to vector<8x32xf32>
    %58 = arith.mulf %55, %45 : vector<8x32xf32>
    %59 = arith.mulf %54, %56 : vector<8x32xf32>
    %60 = arith.addf %58, %59 : vector<8x32xf32>
    %61 = math.tanh %60 : vector<8x32xf32>
    %62 = arith.mulf %57, %61 : vector<8x32xf32>
    %c1_i32 = arith.constant 1 : i32
    %63 = vector.broadcast %c1_i32 : i32 to vector<8x1xi32>
    %64 = arith.cmpi sgt, %2, %63 : vector<8x1xi32>
    %65 = vector.shape_cast %64 : vector<8x1xi1> to vector<8x1xi1>
    %66 = vector.broadcast %65 : vector<8x1xi1> to vector<8x32xi1>
    %67 = arith.select %66, %62, %42 : vector<8x32xi1>, vector<8x32xf32>
    %68 = vector.shape_cast %64 : vector<8x1xi1> to vector<8x1xi1>
    %69 = vector.broadcast %68 : vector<8x1xi1> to vector<8x32xi1>
    %70 = arith.select %69, %60, %45 : vector<8x32xi1>, vector<8x32xf32>
    %71 = vector.extract_strided_slice %6 {offsets = [16, 0], sizes = [8, 128], strides = [1, 1]} : vector<64x128xf32> to vector<8x128xf32>
    %72 = arith.truncf %67 : vector<8x32xf32> to vector<8x32xbf16>
    %cst_15 = arith.constant dense<0.000000e+00> : vector<8x128xf32>
    %73 = tpu.matmul %72, %1, %cst_15 {dimension_numbers = #tpu.dot_dimension_numbers<[1], [0], [0], [1], [0, 0, 1, 1], [], []>} : vector<8x32xbf16>, vector<32x128xbf16>, vector<8x128xf32> -> vector<8x128xf32>
    %74 = arith.addf %71, %73 : vector<8x128xf32>
    %75 = arith.mulf %74, %15 : vector<8x128xf32>
    %76 = math.tanh %75 : vector<8x128xf32>
    %77 = arith.mulf %76, %15 : vector<8x128xf32>
    %78 = arith.addf %77, %18 : vector<8x128xf32>
    %79 = vector.extract_strided_slice %78 {offsets = [0, 0], sizes = [8, 32], strides = [1, 1]} : vector<8x128xf32> to vector<8x32xf32>
    %80 = vector.extract_strided_slice %78 {offsets = [0, 32], sizes = [8, 32], strides = [1, 1]} : vector<8x128xf32> to vector<8x32xf32>
    %81 = vector.extract_strided_slice %78 {offsets = [0, 64], sizes = [8, 32], strides = [1, 1]} : vector<8x128xf32> to vector<8x32xf32>
    %82 = vector.extract_strided_slice %78 {offsets = [0, 96], sizes = [8, 32], strides = [1, 1]} : vector<8x128xf32> to vector<8x32xf32>
    %83 = arith.mulf %80, %70 : vector<8x32xf32>
    %84 = arith.mulf %79, %81 : vector<8x32xf32>
    %85 = arith.addf %83, %84 : vector<8x32xf32>
    %86 = math.tanh %85 : vector<8x32xf32>
    %87 = arith.mulf %82, %86 : vector<8x32xf32>
    %c2_i32 = arith.constant 2 : i32
    %88 = vector.broadcast %c2_i32 : i32 to vector<8x1xi32>
    %89 = arith.cmpi sgt, %2, %88 : vector<8x1xi32>
    %90 = vector.shape_cast %89 : vector<8x1xi1> to vector<8x1xi1>
    %91 = vector.broadcast %90 : vector<8x1xi1> to vector<8x32xi1>
    %92 = arith.select %91, %87, %67 : vector<8x32xi1>, vector<8x32xf32>
    %93 = vector.shape_cast %89 : vector<8x1xi1> to vector<8x1xi1>
    %94 = vector.broadcast %93 : vector<8x1xi1> to vector<8x32xi1>
    %95 = arith.select %94, %85, %70 : vector<8x32xi1>, vector<8x32xf32>
    %96 = vector.extract_strided_slice %6 {offsets = [24, 0], sizes = [8, 128], strides = [1, 1]} : vector<64x128xf32> to vector<8x128xf32>
    %97 = arith.truncf %92 : vector<8x32xf32> to vector<8x32xbf16>
    %cst_16 = arith.constant dense<0.000000e+00> : vector<8x128xf32>
    %98 = tpu.matmul %97, %1, %cst_16 {dimension_numbers = #tpu.dot_dimension_numbers<[1], [0], [0], [1], [0, 0, 1, 1], [], []>} : vector<8x32xbf16>, vector<32x128xbf16>, vector<8x128xf32> -> vector<8x128xf32>
    %99 = arith.addf %96, %98 : vector<8x128xf32>
    %100 = arith.mulf %99, %15 : vector<8x128xf32>
    %101 = math.tanh %100 : vector<8x128xf32>
    %102 = arith.mulf %101, %15 : vector<8x128xf32>
    %103 = arith.addf %102, %18 : vector<8x128xf32>
    %104 = vector.extract_strided_slice %103 {offsets = [0, 0], sizes = [8, 32], strides = [1, 1]} : vector<8x128xf32> to vector<8x32xf32>
    %105 = vector.extract_strided_slice %103 {offsets = [0, 32], sizes = [8, 32], strides = [1, 1]} : vector<8x128xf32> to vector<8x32xf32>
    %106 = vector.extract_strided_slice %103 {offsets = [0, 64], sizes = [8, 32], strides = [1, 1]} : vector<8x128xf32> to vector<8x32xf32>
    %107 = vector.extract_strided_slice %103 {offsets = [0, 96], sizes = [8, 32], strides = [1, 1]} : vector<8x128xf32> to vector<8x32xf32>
    %108 = arith.mulf %105, %95 : vector<8x32xf32>
    %109 = arith.mulf %104, %106 : vector<8x32xf32>
    %110 = arith.addf %108, %109 : vector<8x32xf32>
    %111 = math.tanh %110 : vector<8x32xf32>
    %112 = arith.mulf %107, %111 : vector<8x32xf32>
    %c3_i32 = arith.constant 3 : i32
    %113 = vector.broadcast %c3_i32 : i32 to vector<8x1xi32>
    %114 = arith.cmpi sgt, %2, %113 : vector<8x1xi32>
    %115 = vector.shape_cast %114 : vector<8x1xi1> to vector<8x1xi1>
    %116 = vector.broadcast %115 : vector<8x1xi1> to vector<8x32xi1>
    %117 = arith.select %116, %112, %92 : vector<8x32xi1>, vector<8x32xf32>
    %118 = vector.shape_cast %114 : vector<8x1xi1> to vector<8x1xi1>
    %119 = vector.broadcast %118 : vector<8x1xi1> to vector<8x32xi1>
    %120 = arith.select %119, %110, %95 : vector<8x32xi1>, vector<8x32xf32>
    %121 = vector.extract_strided_slice %6 {offsets = [32, 0], sizes = [8, 128], strides = [1, 1]} : vector<64x128xf32> to vector<8x128xf32>
    %122 = arith.truncf %117 : vector<8x32xf32> to vector<8x32xbf16>
    %cst_17 = arith.constant dense<0.000000e+00> : vector<8x128xf32>
    %123 = tpu.matmul %122, %1, %cst_17 {dimension_numbers = #tpu.dot_dimension_numbers<[1], [0], [0], [1], [0, 0, 1, 1], [], []>} : vector<8x32xbf16>, vector<32x128xbf16>, vector<8x128xf32> -> vector<8x128xf32>
    %124 = arith.addf %121, %123 : vector<8x128xf32>
    %125 = arith.mulf %124, %15 : vector<8x128xf32>
    %126 = math.tanh %125 : vector<8x128xf32>
    %127 = arith.mulf %126, %15 : vector<8x128xf32>
    %128 = arith.addf %127, %18 : vector<8x128xf32>
    %129 = vector.extract_strided_slice %128 {offsets = [0, 0], sizes = [8, 32], strides = [1, 1]} : vector<8x128xf32> to vector<8x32xf32>
    %130 = vector.extract_strided_slice %128 {offsets = [0, 32], sizes = [8, 32], strides = [1, 1]} : vector<8x128xf32> to vector<8x32xf32>
    %131 = vector.extract_strided_slice %128 {offsets = [0, 64], sizes = [8, 32], strides = [1, 1]} : vector<8x128xf32> to vector<8x32xf32>
    %132 = vector.extract_strided_slice %128 {offsets = [0, 96], sizes = [8, 32], strides = [1, 1]} : vector<8x128xf32> to vector<8x32xf32>
    %133 = arith.mulf %130, %120 : vector<8x32xf32>
    %134 = arith.mulf %129, %131 : vector<8x32xf32>
    %135 = arith.addf %133, %134 : vector<8x32xf32>
    %136 = math.tanh %135 : vector<8x32xf32>
    %137 = arith.mulf %132, %136 : vector<8x32xf32>
    %c4_i32 = arith.constant 4 : i32
    %138 = vector.broadcast %c4_i32 : i32 to vector<8x1xi32>
    %139 = arith.cmpi sgt, %2, %138 : vector<8x1xi32>
    %140 = vector.shape_cast %139 : vector<8x1xi1> to vector<8x1xi1>
    %141 = vector.broadcast %140 : vector<8x1xi1> to vector<8x32xi1>
    %142 = arith.select %141, %137, %117 : vector<8x32xi1>, vector<8x32xf32>
    %143 = vector.shape_cast %139 : vector<8x1xi1> to vector<8x1xi1>
    %144 = vector.broadcast %143 : vector<8x1xi1> to vector<8x32xi1>
    %145 = arith.select %144, %135, %120 : vector<8x32xi1>, vector<8x32xf32>
    %146 = vector.extract_strided_slice %6 {offsets = [40, 0], sizes = [8, 128], strides = [1, 1]} : vector<64x128xf32> to vector<8x128xf32>
    %147 = arith.truncf %142 : vector<8x32xf32> to vector<8x32xbf16>
    %cst_18 = arith.constant dense<0.000000e+00> : vector<8x128xf32>
    %148 = tpu.matmul %147, %1, %cst_18 {dimension_numbers = #tpu.dot_dimension_numbers<[1], [0], [0], [1], [0, 0, 1, 1], [], []>} : vector<8x32xbf16>, vector<32x128xbf16>, vector<8x128xf32> -> vector<8x128xf32>
    %149 = arith.addf %146, %148 : vector<8x128xf32>
    %150 = arith.mulf %149, %15 : vector<8x128xf32>
    %151 = math.tanh %150 : vector<8x128xf32>
    %152 = arith.mulf %151, %15 : vector<8x128xf32>
    %153 = arith.addf %152, %18 : vector<8x128xf32>
    %154 = vector.extract_strided_slice %153 {offsets = [0, 0], sizes = [8, 32], strides = [1, 1]} : vector<8x128xf32> to vector<8x32xf32>
    %155 = vector.extract_strided_slice %153 {offsets = [0, 32], sizes = [8, 32], strides = [1, 1]} : vector<8x128xf32> to vector<8x32xf32>
    %156 = vector.extract_strided_slice %153 {offsets = [0, 64], sizes = [8, 32], strides = [1, 1]} : vector<8x128xf32> to vector<8x32xf32>
    %157 = vector.extract_strided_slice %153 {offsets = [0, 96], sizes = [8, 32], strides = [1, 1]} : vector<8x128xf32> to vector<8x32xf32>
    %158 = arith.mulf %155, %145 : vector<8x32xf32>
    %159 = arith.mulf %154, %156 : vector<8x32xf32>
    %160 = arith.addf %158, %159 : vector<8x32xf32>
    %161 = math.tanh %160 : vector<8x32xf32>
    %162 = arith.mulf %157, %161 : vector<8x32xf32>
    %c5_i32 = arith.constant 5 : i32
    %163 = vector.broadcast %c5_i32 : i32 to vector<8x1xi32>
    %164 = arith.cmpi sgt, %2, %163 : vector<8x1xi32>
    %165 = vector.shape_cast %164 : vector<8x1xi1> to vector<8x1xi1>
    %166 = vector.broadcast %165 : vector<8x1xi1> to vector<8x32xi1>
    %167 = arith.select %166, %162, %142 : vector<8x32xi1>, vector<8x32xf32>
    %168 = vector.shape_cast %164 : vector<8x1xi1> to vector<8x1xi1>
    %169 = vector.broadcast %168 : vector<8x1xi1> to vector<8x32xi1>
    %170 = arith.select %169, %160, %145 : vector<8x32xi1>, vector<8x32xf32>
    %171 = vector.extract_strided_slice %6 {offsets = [48, 0], sizes = [8, 128], strides = [1, 1]} : vector<64x128xf32> to vector<8x128xf32>
    %172 = arith.truncf %167 : vector<8x32xf32> to vector<8x32xbf16>
    %cst_19 = arith.constant dense<0.000000e+00> : vector<8x128xf32>
    %173 = tpu.matmul %172, %1, %cst_19 {dimension_numbers = #tpu.dot_dimension_numbers<[1], [0], [0], [1], [0, 0, 1, 1], [], []>} : vector<8x32xbf16>, vector<32x128xbf16>, vector<8x128xf32> -> vector<8x128xf32>
    %174 = arith.addf %171, %173 : vector<8x128xf32>
    %175 = arith.mulf %174, %15 : vector<8x128xf32>
    %176 = math.tanh %175 : vector<8x128xf32>
    %177 = arith.mulf %176, %15 : vector<8x128xf32>
    %178 = arith.addf %177, %18 : vector<8x128xf32>
    %179 = vector.extract_strided_slice %178 {offsets = [0, 0], sizes = [8, 32], strides = [1, 1]} : vector<8x128xf32> to vector<8x32xf32>
    %180 = vector.extract_strided_slice %178 {offsets = [0, 32], sizes = [8, 32], strides = [1, 1]} : vector<8x128xf32> to vector<8x32xf32>
    %181 = vector.extract_strided_slice %178 {offsets = [0, 64], sizes = [8, 32], strides = [1, 1]} : vector<8x128xf32> to vector<8x32xf32>
    %182 = vector.extract_strided_slice %178 {offsets = [0, 96], sizes = [8, 32], strides = [1, 1]} : vector<8x128xf32> to vector<8x32xf32>
    %183 = arith.mulf %180, %170 : vector<8x32xf32>
    %184 = arith.mulf %179, %181 : vector<8x32xf32>
    %185 = arith.addf %183, %184 : vector<8x32xf32>
    %186 = math.tanh %185 : vector<8x32xf32>
    %187 = arith.mulf %182, %186 : vector<8x32xf32>
    %c6_i32 = arith.constant 6 : i32
    %188 = vector.broadcast %c6_i32 : i32 to vector<8x1xi32>
    %189 = arith.cmpi sgt, %2, %188 : vector<8x1xi32>
    %190 = vector.shape_cast %189 : vector<8x1xi1> to vector<8x1xi1>
    %191 = vector.broadcast %190 : vector<8x1xi1> to vector<8x32xi1>
    %192 = arith.select %191, %187, %167 : vector<8x32xi1>, vector<8x32xf32>
    %193 = vector.shape_cast %189 : vector<8x1xi1> to vector<8x1xi1>
    %194 = vector.broadcast %193 : vector<8x1xi1> to vector<8x32xi1>
    %195 = arith.select %194, %185, %170 : vector<8x32xi1>, vector<8x32xf32>
    %196 = vector.extract_strided_slice %6 {offsets = [56, 0], sizes = [8, 128], strides = [1, 1]} : vector<64x128xf32> to vector<8x128xf32>
    %197 = arith.truncf %192 : vector<8x32xf32> to vector<8x32xbf16>
    %cst_20 = arith.constant dense<0.000000e+00> : vector<8x128xf32>
    %198 = tpu.matmul %197, %1, %cst_20 {dimension_numbers = #tpu.dot_dimension_numbers<[1], [0], [0], [1], [0, 0, 1, 1], [], []>} : vector<8x32xbf16>, vector<32x128xbf16>, vector<8x128xf32> -> vector<8x128xf32>
    %199 = arith.addf %196, %198 : vector<8x128xf32>
    %200 = arith.mulf %199, %15 : vector<8x128xf32>
    %201 = math.tanh %200 : vector<8x128xf32>
    %202 = arith.mulf %201, %15 : vector<8x128xf32>
    %203 = arith.addf %202, %18 : vector<8x128xf32>
    %204 = vector.extract_strided_slice %203 {offsets = [0, 0], sizes = [8, 32], strides = [1, 1]} : vector<8x128xf32> to vector<8x32xf32>
    %205 = vector.extract_strided_slice %203 {offsets = [0, 32], sizes = [8, 32], strides = [1, 1]} : vector<8x128xf32> to vector<8x32xf32>
    %206 = vector.extract_strided_slice %203 {offsets = [0, 64], sizes = [8, 32], strides = [1, 1]} : vector<8x128xf32> to vector<8x32xf32>
    %207 = arith.mulf %205, %195 : vector<8x32xf32>
    %208 = arith.mulf %204, %206 : vector<8x32xf32>
    %209 = arith.addf %207, %208 : vector<8x32xf32>
    %c7_i32 = arith.constant 7 : i32
    %210 = vector.broadcast %c7_i32 : i32 to vector<8x1xi32>
    %211 = arith.cmpi sgt, %2, %210 : vector<8x1xi32>
    %212 = vector.shape_cast %211 : vector<8x1xi1> to vector<8x1xi1>
    %213 = vector.broadcast %212 : vector<8x1xi1> to vector<8x32xi1>
    %214 = arith.select %213, %209, %195 : vector<8x32xi1>, vector<8x32xf32>
    %c0_21 = arith.constant 0 : index
    %c0_22 = arith.constant 0 : index
    %215 = vector.load %arg4[%c0_21, %c0_22] : memref<8x32xf32, #tpu.memory_space<vmem>>, vector<8x32xf32>
    tpu.vector_store %arg4[%c0_21, %c0_22], %214 {strides = array<i32>} : memref<8x32xf32, #tpu.memory_space<vmem>>, vector<8x32xf32>,
    return
  }
}

</mosaic_0001>

<bundles_post_ra>
// kernel: tpu_custom_call.1
= control target key start
LH: loop header
LB: loop body
LE: loop exit
PB: predicated region body
PF: predicated region fallthrough
CT: control target
= control target key end

     0   :  { %v986_v1 = vmov 0.0   ;;  %vm987_vm0 = vmmov 0   ;;  %v988_v8 = vmov 0   ;;  %s1245_s0 = inlined_call_operand.vmem [shape: f32[64,32], index: 0, kind: input, shape index: {}]   ;;  %s1246_s1 = inlined_call_operand.vmem [shape: s32[8,1], index: 1, kind: input, shape index: {}]   ;;  %s1247_s2 = inlined_call_operand.vmem [shape: bf16[32,128], index: 2, kind: input, shape index: {}]   ;;  %s1248_s3 = inlined_call_operand.vmem [shape: bf16[32,128], index: 3, kind: input, shape index: {}]   ;;  %s1249_s4 = inlined_call_operand.hbm [shape: f32[8,32], index: 4, kind: output, shape index: {}]  }
   0x1   :  { %v1022_v0 = vld [vmem:[%s1248_s3] sm:$0xff]   ;;  %838 = vmatprep.subr.bf16.mxu1 %v986_v1  ;;  %v1032_v3 = vld [vmem:[%s1248_s3 + $0x8] sm:$0xff]   ;;  %842 = vmatprep.mubr.msk.bf16.mxu1 %vm987_vm0, %v986_v1  ;;  %v30_v7 = vld [vmem:[%s1245_s0 + $0x10] sm:$0xff] }
   0x2   :  { %v913_v2 = vld [vmem:[%s1247_s2] sm:$0xff]   ;;  %839 = vmatpush3.bf16.msra.mxu1 %v1022_v0  ;;  %v915_v4 = vld [vmem:[%s1247_s2 + $0x8] sm:$0xff]   ;;  %910 = vset.pattern.permute.xlu1 %v988_v8  ;;  %v31_v9 = vld [vmem:[%s1245_s0 + $0x18] sm:$0xff] }
   0x3   :  { %826 = vmatprep.subr.bf16.mxu0 %v913_v2  ;;  %840 = vmatprep.subr.bf16.mxu1 %v986_v1  ;;  %v28_v5 = vld [vmem:[%s1245_s0] sm:$0xff]  ;;  %v29_v6 = vld [vmem:[%s1245_s0 + $0x8] sm:$0xff] }
   0x4   :  { %827 = vmatpush3.bf16.msra.mxu0 %v913_v2  ;;  %916 = vtanh.f32 %v28_v5  ;;  %911 = vset.pattern.permute.xlu0 %v988_v8 }
   0x5   :  { %828 = vmatprep.subr.bf16.mxu0 %v915_v4 }
   0x6   :  { %9 = vsyncpa [#allocation3], 0  ;;  %841 = vmatpush3.bf16.msra.mxu1 %v1032_v3  ;;  %918 = vtanh.f32 %v29_v6  ;;  %vm60_vm1 = vcmask 261120   ;;  %v1073_v16 = vld [vmem:[%s1246_s1] sm:$0xff]  ;;  %v138_v18 = vlaneseq  ;;  %v989_v26 = vmov 0.5   ;;  %s990_s1 = smov 64  }
   0x7   :  { %920 = vtanh.f32 %v30_v7  ;;  %846 = vmatprep.subr.bf16.mxu1 %v986_v1  ;;  %vm222_vm2 = vcmp.gt.s32.totalorder %v1073_v16, 0  ;;  %s991_s5 = smov 32   ;;  %vm299_vm7 = vcmp.gt.s32.totalorder %v1073_v16, 1  ;;  %v32_v2 = vld [vmem:[%s1245_s0 + $0x20] sm:$0xff]  ;;  %v34_v5 = vld [vmem:[%s1245_s0 + $0x30] sm:$0xff]  ;;  %v35_v6 = vld [vmem:[%s1245_s0 + $0x38] sm:$0xff] }
   0x8   :  { %829 = vmatpush3.bf16.msra.mxu0 %v915_v4  ;;  %922 = vtanh.f32 %v31_v9  ;;  %v223_v17 = vsel %vm222_vm2, 1, %v988_v8  ;;  %v139_v22 = vand.u32 127, %v138_v18  ;;  %v300_v57 = vsel %vm299_vm7, 1, %v988_v8  ;;  %v33_v4 = vld [vmem:[%s1245_s0 + $0x28] sm:$0xff]  ;;  %s992_s0 = smov 96   ;;  %s993_s14 = smov [#allocation2]  }
   0x9   :  { %843 = vmatmul.mubr.bf16.vlgmr.msra.gmra.mrb[0].mxu1 %v988_v8  ;;  %854 = vmatprep.subr.bf16.mxu0 %v986_v1  ;;  %vm376_vm9 = vcmp.gt.s32.totalorder %v1073_v16, 2  ;;  %vm453_vm11 = vcmp.gt.s32.totalorder %v1073_v16, 3  ;;  %vm530_vm13 = vcmp.gt.s32.totalorder %v1073_v16, 4  ;;  %vm607_vm15 = vcmp.gt.s32.totalorder %v1073_v16, 5  ;;  %s773_s15 = sshll.u32 %s993_s14, 4  ;;  %s774_s15 = int_to_ptr.vmem [resolvable:$true] %s773_s15 }
   0xa   :  { %847 = vmatpush3.bf16.msra.mxu1 %v1022_v0  ;;  %850 = vmatprep.mubr.msk.bf16.mxu1 %vm987_vm0, %v986_v1  ;;  %vm140_vm3 = vcmp.ge.s32.totalorder %v139_v22, 64  ;;  %vm141_vm4 = vcmp.lt.s32.totalorder %v139_v22, 96  ;;  %vm684_vm2 = vcmp.gt.s32.totalorder %v1073_v16, 6  ;;  %s962_s16 = scalar_lea.vmem %s774_s15, 128  ;;  %p967_p1 = scmp.lt.s32.totalorder %s774_s15, %s774_s15 }
   0xb   :  { %848 = vmatprep.subr.bf16.mxu1 %v986_v1  ;;  %225 = vperm.xlu1 %910, %v223_v17   ;;  %vm142_vm5 = vmand %vm140_vm3, %vm141_vm4  ;;  %vm755_vm4 = vcmp.gt.s32.totalorder %v1073_v16, 7  ;;  %p963_p0 = scmp.ne.s32.totalorder %s774_s15, %s962_s16  ;;  %p968_p2 = scmp.lt.s32.totalorder %s962_s16, %s962_s16 }
   0xc   :  { %v1079_v27 = vsel %vm142_vm5, 1.0, %v989_v26  ;;  %v1084_v33 = vsel %vm142_vm5, 0.0, %v989_v26 }
   0xd   :  { %p969_p3 = por %p968_p2, %p967_p1 }
   0xe   :  { %849 = vmatpush3.bf16.msra.mxu1 %v1032_v3  ;;  %v917_v10 = vpop.eup %916 }
   0xf   :  { %862 = vmatprep.subr.bf16.mxu1 %v986_v1  ;;  %p970_p4 = pnand %p969_p3, %p963_p0 }
  0x10   :  { %v919_v11 = vpop.eup %918 }
  0x11   :  { %v921_v12 = vpop.eup %920  ;;  %v44_v13 = vpack.c.bf16 %v919_v11, %v917_v10 }
  0x12   :  { %v923_v14 = vpop.eup %922 }
  0x13   :  { %830 = vmatprep.mubr.msk.bf16.mxu0 %vm60_vm1, %v44_v13  ;;  %v45_v15 = vpack.c.bf16 %v923_v14, %v921_v12 }
  0x15   :  { %831 = vmatmul.mubr.msk.bf16.vlgmr.msra.gmra.mrb[0].mxu0 %vm60_vm1, %v45_v15 }
  0x16   :  { %855 = vmatpush3.bf16.msra.mxu0 %v1022_v0 }
  0x17   :  { %856 = vmatprep.subr.bf16.mxu0 %v986_v1 }
  0x1a   :  { %857 = vmatpush3.bf16.msra.mxu0 %v1032_v3 }
  0x1b   :  { %870 = vmatprep.subr.bf16.mxu0 %v986_v1 }
  0x8a   :  { %v226_v42 = vpop.permute.xlu1 %225 }
  0x8b   :  { %vm227_vm6 = vcmp.eq.s32.totalorder %v226_v42, 1 }
  0xdc   :  { %v194_v19 = vpop.f32.mrb[0].mxu1 }
  0xdd   :  { %v844_v20 = vpop.f32.mrb[1].mxu1 }
  0xde   :  { %v197_v21 = vpop.f32.mrb[2].mxu1 }
  0xdf   :  { %v845_v23 = vpop.f32.mrb[3].mxu1 }
  0xe8   :  { %v1077_v24 = vpop.f32.mrb[0].mxu0 }
  0xe9   :  { %v107_v25 = vpop.f32.mrb[1].mxu0 }
  0xea   :  { %v200_v28 = vadd.f32 %v194_v19, %v107_v25  ;;  %v1081_v29 = vpop.f32.mrb[2].mxu0 }
  0xeb   :  { %v110_v30 = vpop.f32.mrb[3].mxu0 }
  0xec   :  { %v201_v31 = vmul.f32 %v200_v28, %v1079_v27 }
  0xee   :  { %924 = vtanh.f32 %v201_v31 }
  0xf8   :  { %v925_v32 = vpop.eup %924 }
  0xf9   :  { %v203_v34 = vmul.f32 %v925_v32, %v1079_v27 }
  0xfb   :  { %v204_v35 = vadd.f32 %v203_v34, %v1084_v33 }
  0xfd   :  { %207 = vrot.lane.b32.xlu0 %v204_v35, %s990_s1  ;;  %v205_v38 = vmul.f32 0.0, %v204_v35 }
 0x16f   :  { %v208_v36 = vpop.permute.xlu0 %207 }
 0x170   :  { %v210_v37 = vmul.f32 %v208_v36, %v204_v35 }
 0x172   :  { %212 = vrot.lane.b32.xlu0 %v210_v37, %s991_s5 }
 0x1e4   :  { %v213_v39 = vpop.permute.xlu0 %212 }
 0x1e5   :  { %v215_v40 = vadd.f32 %v213_v39, %v205_v38  ;;  %v377_v39 = vsel %vm376_vm9, 1, %v988_v8 }
 0x1e7   :  { %926 = vtanh.f32 %v215_v40  ;;  %v229_v60 = vsel %vm227_vm6, %v215_v40, 0.0 }
 0x1f1   :  { %v927_v41 = vpop.eup %926 }
 0x1f2   :  { %218 = vrot.lane.b32.xlu1 %v927_v41, %s990_s1 }
 0x264   :  { %v219_v43 = vpop.permute.xlu1 %218 }
 0x265   :  { %v221_v44 = vmul.f32 %v219_v43, %v204_v35 }
 0x267   :  { %v228_v45 = vsel %vm227_vm6, %v221_v44, 0.0 }
 0x268   :  { %v230_v46 = vpack.c.bf16 %v228_v45, %v228_v45 }
 0x26a   :  { %232 = vrot.lane.b32.xlu0 %v230_v46, %s991_s5 }
 0x2dc   :  { %v233_v47 = vpop.permute.xlu0 %232 }
 0x2dd   :  { %851 = vmatmul.mubr.msk.bf16.vlgmr.msra.gmra.mrb[4].mxu1 %vm60_vm1, %v233_v47 }
 0x2de   :  { %863 = vmatpush3.bf16.msra.mxu1 %v1022_v0  ;;  %866 = vmatprep.mubr.msk.bf16.mxu1 %vm987_vm0, %v986_v1 }
 0x2df   :  { %864 = vmatprep.subr.bf16.mxu1 %v986_v1 }
 0x2e2   :  { %865 = vmatpush3.bf16.msra.mxu1 %v1032_v3 }
 0x2e3   :  { %878 = vmatprep.subr.bf16.mxu1 %v986_v1 }
 0x3b0   :  { %v271_v48 = vpop.f32.mrb[4].mxu1 }
 0x3b1   :  { %v277_v49 = vadd.f32 %v271_v48, %v110_v30  ;;  %v852_v50 = vpop.f32.mrb[5].mxu1 }
 0x3b2   :  { %v274_v51 = vpop.f32.mrb[6].mxu1 }
 0x3b3   :  { %v278_v52 = vmul.f32 %v277_v49, %v1079_v27  ;;  %v853_v53 = vpop.f32.mrb[7].mxu1 }
 0x3b5   :  { %928 = vtanh.f32 %v278_v52 }
 0x3bf   :  { %v929_v54 = vpop.eup %928 }
 0x3c0   :  { %v280_v55 = vmul.f32 %v929_v54, %v1079_v27 }
 0x3c2   :  { %v281_v56 = vadd.f32 %v280_v55, %v1084_v33 }
 0x3c4   :  { %284 = vrot.lane.b32.xlu1 %v281_v56, %s990_s1  ;;  %v282_v61 = vmul.f32 %v281_v56, %v229_v60 }
 0x3c8   :  { %302 = vperm.xlu1 %910, %v300_v57  }
 0x436   :  { %v285_v58 = vpop.permute.xlu1 %284 }
 0x437   :  { %v287_v59 = vmul.f32 %v285_v58, %v281_v56 }
 0x439   :  { %289 = vrot.lane.b32.xlu0 %v287_v59, %s991_s5 }
 0x447   :  { %v303_v15 = vpop.permute.xlu1 %302 }
 0x448   :  { %vm304_vm8 = vcmp.eq.s32.totalorder %v303_v15, 1 }
 0x4ab   :  { %v290_v62 = vpop.permute.xlu0 %289 }
 0x4ac   :  { %v292_v63 = vadd.f32 %v290_v62, %v282_v61  ;;  %v454_v61 = vsel %vm453_vm11, 1, %v988_v8 }
 0x4ae   :  { %930 = vtanh.f32 %v292_v63  ;;  %v306_v41 = vsel %vm304_vm8, %v292_v63, %v229_v60 }
 0x4af   :  { %932 = vtanh.f32 %v32_v2 }
 0x4b0   :  { %934 = vtanh.f32 %v33_v4 }
 0x4b1   :  { %936 = vtanh.f32 %v34_v5 }
 0x4b2   :  { %938 = vtanh.f32 %v35_v6 }
 0x4b8   :  { %v931_v7 = vpop.eup %930 }
 0x4b9   :  { %295 = vrot.lane.b32.xlu0 %v931_v7, %s990_s1  ;;  %v933_v9 = vpop.eup %932 }
 0x4ba   :  { %v935_v10 = vpop.eup %934 }
 0x4bb   :  { %v937_v11 = vpop.eup %936  ;;  %v46_v12 = vpack.c.bf16 %v935_v10, %v933_v9 }
 0x4bc   :  { %v939_v13 = vpop.eup %938 }
 0x4bd   :  { %834 = vmatprep.mubr.msk.bf16.mxu0 %vm60_vm1, %v46_v12  ;;  %v47_v14 = vpack.c.bf16 %v939_v13, %v937_v11 }
 0x4bf   :  { %835 = vmatmul.mubr.msk.bf16.gmra.mrb[4].mxu0 %vm60_vm1, %v47_v14 }
 0x4c0   :  { %858 = vmatprep.mubr.msk.bf16.mxu0 %vm987_vm0, %v986_v1 }
 0x52b   :  { %v296_v17 = vpop.permute.xlu0 %295 }
 0x52c   :  { %v298_v18 = vmul.f32 %v296_v17, %v281_v56 }
 0x52e   :  { %v305_v19 = vsel %vm304_vm8, %v298_v18, %v228_v45 }
 0x52f   :  { %v307_v20 = vpack.c.bf16 %v305_v19, %v305_v19 }
 0x531   :  { %309 = vrot.lane.b32.xlu1 %v307_v20, %s991_s5 }
 0x592   :  { %v1127_v21 = vpop.f32.mrb[4].mxu0 }
 0x593   :  { %v1129_v22 = vpop.f32.mrb[5].mxu0 }
 0x594   :  { %v1131_v23 = vpop.f32.mrb[6].mxu0 }
 0x595   :  { %v1133_v25 = vpop.f32.mrb[7].mxu0 }
 0x5a3   :  { %v310_v26 = vpop.permute.xlu1 %309 }
 0x5a4   :  { %859 = vmatmul.mubr.msk.bf16.vlgmr.msra.gmra.mrb[8].mxu0 %vm60_vm1, %v310_v26 }
 0x5a5   :  { %871 = vmatpush3.bf16.msra.mxu0 %v1022_v0  ;;  %874 = vmatprep.mubr.msk.bf16.mxu0 %vm987_vm0, %v986_v1 }
 0x5a6   :  { %872 = vmatprep.subr.bf16.mxu0 %v986_v1 }
 0x5a9   :  { %873 = vmatpush3.bf16.msra.mxu0 %v1032_v3 }
 0x5aa   :  { %886 = vmatprep.subr.bf16.mxu0 %v986_v1 }
 0x677   :  { %v348_v28 = vpop.f32.mrb[8].mxu0 }
 0x678   :  { %v354_v30 = vadd.f32 %v1077_v24, %v348_v28  ;;  %v860_v31 = vpop.f32.mrb[9].mxu0 }
 0x679   :  { %v351_v32 = vpop.f32.mrb[10].mxu0  ;;  %v531_v31 = vsel %vm530_vm13, 1, %v988_v8 }
 0x67a   :  { %v355_v34 = vmul.f32 %v354_v30, %v1079_v27  ;;  %v861_v35 = vpop.f32.mrb[11].mxu0 }
 0x67c   :  { %940 = vtanh.f32 %v355_v34 }
 0x686   :  { %v941_v36 = vpop.eup %940 }
 0x687   :  { %v357_v37 = vmul.f32 %v941_v36, %v1079_v27 }
 0x689   :  { %v358_v38 = vadd.f32 %v357_v37, %v1084_v33 }
 0x68b   :  { %361 = vrot.lane.b32.xlu0 %v358_v38, %s990_s1  ;;  %v359_v42 = vmul.f32 %v358_v38, %v306_v41 }
 0x68f   :  { %379 = vperm.xlu0 %911, %v377_v39  }
 0x6fd   :  { %v362_v40 = vpop.permute.xlu0 %361 }
 0x6fe   :  { %v364_v24 = vmul.f32 %v362_v40, %v358_v38 }
 0x700   :  { %366 = vrot.lane.b32.xlu1 %v364_v24, %s991_s5 }
 0x70e   :  { %v380_v46 = vpop.permute.xlu0 %379 }
 0x70f   :  { %vm381_vm10 = vcmp.eq.s32.totalorder %v380_v46, 1 }
 0x772   :  { %v367_v43 = vpop.permute.xlu1 %366 }
 0x773   :  { %v369_v44 = vadd.f32 %v367_v43, %v359_v42 }
 0x775   :  { %942 = vtanh.f32 %v369_v44  ;;  %v383_v63 = vsel %vm381_vm10, %v369_v44, %v306_v41 }
 0x77f   :  { %v943_v45 = vpop.eup %942 }
 0x780   :  { %372 = vrot.lane.b32.xlu1 %v943_v45, %s990_s1 }
 0x7f2   :  { %v373_v47 = vpop.permute.xlu1 %372 }
 0x7f3   :  { %v375_v48 = vmul.f32 %v373_v47, %v358_v38 }
 0x7f5   :  { %v382_v49 = vsel %vm381_vm10, %v375_v48, %v305_v19 }
 0x7f6   :  { %v384_v50 = vpack.c.bf16 %v382_v49, %v382_v49 }
 0x7f8   :  { %386 = vrot.lane.b32.xlu1 %v384_v50, %s991_s5 }
 0x86a   :  { %v387_v51 = vpop.permute.xlu1 %386 }
 0x86b   :  { %867 = vmatmul.mubr.msk.bf16.vlgmr.msra.gmra.mrb[8].mxu1 %vm60_vm1, %v387_v51 }
 0x86c   :  { %879 = vmatpush3.bf16.msra.mxu1 %v1022_v0  ;;  %882 = vmatprep.mubr.msk.bf16.mxu1 %vm987_vm0, %v986_v1 }
 0x86d   :  { %880 = vmatprep.subr.bf16.mxu1 %v986_v1 }
 0x870   :  { %881 = vmatpush3.bf16.msra.mxu1 %v1032_v3 }
 0x871   :  { %894 = vmatprep.subr.bf16.mxu1 %v986_v1 }
 0x93e   :  { %v425_v52 = vpop.f32.mrb[8].mxu1 }
 0x93f   :  { %v431_v53 = vadd.f32 %v1081_v29, %v425_v52  ;;  %v868_v54 = vpop.f32.mrb[9].mxu1 }
 0x940   :  { %v428_v55 = vpop.f32.mrb[10].mxu1 }
 0x941   :  { %v432_v56 = vmul.f32 %v431_v53, %v1079_v27  ;;  %v869_v57 = vpop.f32.mrb[11].mxu1 }
 0x943   :  { %944 = vtanh.f32 %v432_v56 }
 0x94d   :  { %v945_v58 = vpop.eup %944 }
 0x94e   :  { %v434_v59 = vmul.f32 %v945_v58, %v1079_v27 }
 0x950   :  { %v435_v60 = vadd.f32 %v434_v59, %v1084_v33 }
 0x952   :  { %438 = vrot.lane.b32.xlu0 %v435_v60, %s990_s1  ;;  %v436_v2 = vmul.f32 %v435_v60, %v383_v63 }
 0x956   :  { %456 = vperm.xlu0 %911, %v454_v61  }
 0x9c4   :  { %v439_v62 = vpop.permute.xlu0 %438 }
 0x9c5   :  { %v441_v29 = vmul.f32 %v439_v62, %v435_v60 }
 0x9c7   :  { %443 = vrot.lane.b32.xlu1 %v441_v29, %s991_s5 }
 0x9d5   :  { %v457_v7 = vpop.permute.xlu0 %456 }
 0x9d6   :  { %vm458_vm12 = vcmp.eq.s32.totalorder %v457_v7, 1 }
 0xa39   :  { %v444_v4 = vpop.permute.xlu1 %443 }
 0xa3a   :  { %v446_v5 = vadd.f32 %v444_v4, %v436_v2 }
 0xa3c   :  { %946 = vtanh.f32 %v446_v5  ;;  %v460_v34 = vsel %vm458_vm12, %v446_v5, %v383_v63 }
 0xa46   :  { %v947_v6 = vpop.eup %946 }
 0xa47   :  { %449 = vrot.lane.b32.xlu1 %v947_v6, %s990_s1 }
 0xab9   :  { %v450_v9 = vpop.permute.xlu1 %449 }
 0xaba   :  { %v452_v10 = vmul.f32 %v450_v9, %v435_v60 }
 0xabc   :  { %v459_v11 = vsel %vm458_vm12, %v452_v10, %v382_v49 }
 0xabd   :  { %v461_v12 = vpack.c.bf16 %v459_v11, %v459_v11 }
 0xabf   :  { %463 = vrot.lane.b32.xlu0 %v461_v12, %s991_s5 }
 0xb31   :  { %v464_v13 = vpop.permute.xlu0 %463 }
 0xb32   :  { %875 = vmatmul.mubr.msk.bf16.vlgmr.msra.gmra.mrb[12].mxu0 %vm60_vm1, %v464_v13 }
 0xb33   :  { %887 = vmatpush3.bf16.msra.mxu0 %v1022_v0  ;;  %890 = vmatprep.mubr.msk.bf16.mxu0 %vm987_vm0, %v986_v1 }
 0xb34   :  { %888 = vmatprep.subr.bf16.mxu0 %v986_v1 }
 0xb37   :  { %889 = vmatpush3.bf16.msra.mxu0 %v1032_v3 }
 0xc05   :  { %v502_v14 = vpop.f32.mrb[12].mxu0 }
 0xc06   :  { %v508_v15 = vadd.f32 %v502_v14, %v1129_v22  ;;  %v876_v17 = vpop.f32.mrb[13].mxu0 }
 0xc07   :  { %v505_v18 = vpop.f32.mrb[14].mxu0 }
 0xc08   :  { %v509_v19 = vmul.f32 %v508_v15, %v1079_v27  ;;  %v877_v20 = vpop.f32.mrb[15].mxu0 }
 0xc0a   :  { %948 = vtanh.f32 %v509_v19 }
 0xc14   :  { %v949_v26 = vpop.eup %948 }
 0xc15   :  { %v511_v28 = vmul.f32 %v949_v26, %v1079_v27 }
 0xc17   :  { %v512_v30 = vadd.f32 %v511_v28, %v1084_v33 }
 0xc19   :  { %515 = vrot.lane.b32.xlu1 %v512_v30, %s990_s1  ;;  %v513_v35 = vmul.f32 %v512_v30, %v460_v34 }
 0xc1d   :  { %533 = vperm.xlu1 %910, %v531_v31   ;;  %v756_v31 = vsel %vm755_vm4, 1, %v988_v8 }
 0xc8b   :  { %v516_v32 = vpop.permute.xlu1 %515 }
 0xc8c   :  { %v518_v22 = vmul.f32 %v516_v32, %v512_v30 }
 0xc8e   :  { %520 = vrot.lane.b32.xlu0 %v518_v22, %s991_s5 }
 0xc9c   :  { %v534_v39 = vpop.permute.xlu1 %533 }
 0xc9d   :  { %vm535_vm14 = vcmp.eq.s32.totalorder %v534_v39, 1 }
 0xd00   :  { %v521_v36 = vpop.permute.xlu0 %520 }
 0xd01   :  { %v523_v37 = vadd.f32 %v521_v36, %v513_v35 }
 0xd03   :  { %950 = vtanh.f32 %v523_v37  ;;  %v537_v52 = vsel %vm535_vm14, %v523_v37, %v460_v34 }
 0xd0d   :  { %v951_v38 = vpop.eup %950 }
 0xd0e   :  { %526 = vrot.lane.b32.xlu0 %v951_v38, %s990_s1 }
 0xd80   :  { %v527_v40 = vpop.permute.xlu0 %526 }
 0xd81   :  { %v529_v24 = vmul.f32 %v527_v40, %v512_v30 }
 0xd83   :  { %v536_v41 = vsel %vm535_vm14, %v529_v24, %v459_v11  ;;  %v685_v11 = vsel %vm684_vm2, 1, %v988_v8 }
 0xd84   :  { %v538_v42 = vpack.c.bf16 %v536_v41, %v536_v41 }
 0xd86   :  { %540 = vrot.lane.b32.xlu1 %v538_v42, %s991_s5 }
 0xdf8   :  { %v541_v43 = vpop.permute.xlu1 %540 }
 0xdf9   :  { %883 = vmatmul.mubr.msk.bf16.vlgmr.msra.gmra.mrb[12].mxu1 %vm60_vm1, %v541_v43 }
 0xdfa   :  { %895 = vmatpush3.bf16.msra.mxu1 %v1022_v0  ;;  %898 = vmatprep.mubr.msk.bf16.mxu1 %vm987_vm0, %v986_v1 }
 0xdfb   :  { %896 = vmatprep.subr.bf16.mxu1 %v986_v1  ;;  %v608_v1 = vsel %vm607_vm15, 1, %v988_v8 }
 0xdfe   :  { %897 = vmatpush3.bf16.msra.mxu1 %v1032_v3 }
 0xecc   :  { %v579_v44 = vpop.f32.mrb[12].mxu1 }
 0xecd   :  { %v585_v45 = vadd.f32 %v579_v44, %v1133_v25  ;;  %v884_v46 = vpop.f32.mrb[13].mxu1 }
 0xece   :  { %v582_v47 = vpop.f32.mrb[14].mxu1 }
 0xecf   :  { %v586_v48 = vmul.f32 %v585_v45, %v1079_v27  ;;  %v885_v49 = vpop.f32.mrb[15].mxu1 }
 0xed1   :  { %952 = vtanh.f32 %v586_v48 }
 0xedb   :  { %v953_v50 = vpop.eup %952 }
 0xedc   :  { %v588_v51 = vmul.f32 %v953_v50, %v1079_v27 }
 0xede   :  { %v589_v0 = vadd.f32 %v588_v51, %v1084_v33 }
 0xee0   :  { %592 = vrot.lane.b32.xlu0 %v589_v0, %s990_s1  ;;  %v590_v53 = vmul.f32 %v589_v0, %v537_v52 }
 0xee4   :  { %610 = vperm.xlu0 %911, %v608_v1  }
 0xf52   :  { %v593_v3 = vpop.permute.xlu0 %592 }
 0xf53   :  { %v595_v25 = vmul.f32 %v593_v3, %v589_v0 }
 0xf55   :  { %597 = vrot.lane.b32.xlu1 %v595_v25, %s991_s5 }
 0xf63   :  { %v611_v57 = vpop.permute.xlu0 %610 }
 0xf64   :  { %vm612_vm0 = vcmp.eq.s32.totalorder %v611_v57, 1 }
 0xfc7   :  { %v598_v54 = vpop.permute.xlu1 %597 }
 0xfc8   :  { %v600_v55 = vadd.f32 %v598_v54, %v590_v53 }
 0xfca   :  { %954 = vtanh.f32 %v600_v55  ;;  %v614_v13 = vsel %vm612_vm0, %v600_v55, %v537_v52 }
 0xfd4   :  { %v955_v56 = vpop.eup %954 }
 0xfd5   :  { %603 = vrot.lane.b32.xlu1 %v955_v56, %s990_s1 }
0x1047   :  { %v604_v58 = vpop.permute.xlu1 %603 }
0x1048   :  { %v606_v59 = vmul.f32 %v604_v58, %v589_v0 }
0x104a   :  { %v613_v60 = vsel %vm612_vm0, %v606_v59, %v536_v41 }
0x104b   :  { %v615_v61 = vpack.c.bf16 %v613_v60, %v613_v60 }
0x104d   :  { %617 = vrot.lane.b32.xlu0 %v615_v61, %s991_s5 }
0x10bf   :  { %v618_v62 = vpop.permute.xlu0 %617 }
0x10c0   :  { %891 = vmatmul.mubr.msk.bf16.vlgmr.msra.gmra.mrb[16].mxu0 %vm60_vm1, %v618_v62 }
0x1193   :  { %v656_v29 = vpop.f32.mrb[16].mxu0 }
0x1194   :  { %v662_v63 = vadd.f32 %v1127_v21, %v656_v29  ;;  %v892_v2 = vpop.f32.mrb[17].mxu0 }
0x1195   :  { %v659_v4 = vpop.f32.mrb[18].mxu0 }
0x1196   :  { %v663_v5 = vmul.f32 %v662_v63, %v1079_v27  ;;  %v893_v6 = vpop.f32.mrb[19].mxu0 }
0x1198   :  { %956 = vtanh.f32 %v663_v5 }
0x11a2   :  { %v957_v7 = vpop.eup %956 }
0x11a3   :  { %v665_v9 = vmul.f32 %v957_v7, %v1079_v27 }
0x11a5   :  { %v666_v10 = vadd.f32 %v665_v9, %v1084_v33 }
0x11a7   :  { %669 = vrot.lane.b32.xlu1 %v666_v10, %s990_s1  ;;  %v667_v14 = vmul.f32 %v666_v10, %v614_v13 }
0x11ab   :  { %687 = vperm.xlu1 %910, %v685_v11  }
0x1219   :  { %v670_v12 = vpop.permute.xlu1 %669 }
0x121a   :  { %v672_v21 = vmul.f32 %v670_v12, %v666_v10 }
0x121c   :  { %674 = vrot.lane.b32.xlu0 %v672_v21, %s991_s5 }
0x122a   :  { %v688_v19 = vpop.permute.xlu1 %687 }
0x122b   :  { %vm689_vm3 = vcmp.eq.s32.totalorder %v688_v19, 1 }
0x128e   :  { %v675_v15 = vpop.permute.xlu0 %674 }
0x128f   :  { %v677_v17 = vadd.f32 %v675_v15, %v667_v14 }
0x1291   :  { %958 = vtanh.f32 %v677_v17  ;;  %v691_v41 = vsel %vm689_vm3, %v677_v17, %v614_v13 }
0x129b   :  { %v959_v18 = vpop.eup %958 }
0x129c   :  { %680 = vrot.lane.b32.xlu0 %v959_v18, %s990_s1 }
0x130e   :  { %v681_v20 = vpop.permute.xlu0 %680 }
0x130f   :  { %v683_v26 = vmul.f32 %v681_v20, %v666_v10 }
0x1311   :  { %v690_v28 = vsel %vm689_vm3, %v683_v26, %v613_v60 }
0x1312   :  { %v692_v30 = vpack.c.bf16 %v690_v28, %v690_v28 }
0x1314   :  { %694 = vrot.lane.b32.xlu1 %v692_v30, %s991_s5 }
0x1318   :  { %758 = vperm.xlu1 %910, %v756_v31  }
0x1386   :  { %v695_v32 = vpop.permute.xlu1 %694 }
0x1387   :  { %899 = vmatmul.mubr.msk.bf16.vlgmr.msra.gmra.mrb[16].mxu1 %vm60_vm1, %v695_v32 }
0x145a   :  { %v733_v22 = vpop.f32.mrb[16].mxu1 }
0x145b   :  { %v739_v34 = vadd.f32 %v1131_v23, %v733_v22  ;;  %v900_v35 = vpop.f32.mrb[17].mxu1  ;;  %v759_v23 = vpop.permute.xlu1 %758 }
0x145c   :  { %v736_v36 = vpop.f32.mrb[18].mxu1  ;;  %vm760_vm5 = vcmp.eq.s32.totalorder %v759_v23, 1 }
0x145d   :  { %v740_v37 = vmul.f32 %v739_v34, %v1079_v27  ;;  %v901_v38 = vpop.f32.mrb[19].mxu1 }
0x145f   :  { %960 = vtanh.f32 %v740_v37 }
0x1469   :  { %v961_v39 = vpop.eup %960 }
0x146a   :  { %v742_v16 = vmul.f32 %v961_v39, %v1079_v27 }
0x146c   :  { %v743_v40 = vadd.f32 %v742_v16, %v1084_v33 }
0x146e   :  { %746 = vrot.lane.b32.xlu0 %v743_v40, %s990_s1  ;;  %v744_v42 = vmul.f32 %v743_v40, %v691_v41 }
0x14e0   :  { %v747_v8 = vpop.permute.xlu0 %746 }
0x14e1   :  { %v749_v24 = vmul.f32 %v747_v8, %v743_v40 }
0x14e3   :  { %751 = vrot.lane.b32.xlu0 %v749_v24, %s991_s5 }
0x1555   :  { %v752_v43 = vpop.permute.xlu0 %751 }
0x1556   :  { %v754_v44 = vadd.f32 %v752_v43, %v744_v42 }
0x1558   :  { %v761_v45 = vsel %vm760_vm5, %v754_v44, %v691_v41 }
0x1559   :  { %763 = vrot.lane.b32.xlu1 %v761_v45, %s992_s0 }
0x15cb   :  { %v764_v27 = vpop.permute.xlu1 %763 }
0x15cc   :  { %766 = vst.msk [vmem:[#allocation2] sm:$0xff] %vm60_vm1, %v764_v27 }
0x15cd   :  { %973 = shalt.err (!%p970_p4)
}
0x15ce   :  { %s974_s19 = scalar_lea.hbm %s1249_s4, 128 }
0x15cf   :  { %p975_p5 = scmp.ne.s32.totalorder %s1249_s4, %s974_s19  ;;  %p978_p6 = scmp.lt.u32.totalorder %s974_s19, %s1249_s4 }
0x15d1   :  { %p980_p7 = pnand %p978_p6, %p975_p5 }
0x15d3   :  { %983 = shalt.err (!%p980_p7)
}
0x15d4   :  { %776 = dma.vmem_to_hbm [thread:$0]  %s774_s15, 128, %s1249_s4, [#allocation3]  }
0x15d5   :  { %984 = dma.done.wait [#allocation3], 128  }
0x15d6   :  { %985 = vsyncadd [#allocation3], 4294967168 }
0x15d7   :  { %780 = vsyncpa [#allocation3], 1 }

</bundles_post_ra>
